<compile_context>
chip_gen: v7x
topology: tpu7x:2x2x1
jax: 0.10.0
libtpu: 0.0.40
codegen_flags: <defaults>
</compile_context>

<pallas_src>
import functools
import math

import jax
import jax.numpy as jnp
from jax.experimental import pallas as pl
from jax.experimental.pallas import tpu as pltpu


# ---------------------------------------------------------------------------
# Fused kernel: per batch block, layer1 -> relu -> layer2 -> relu ->
# mean-pool -> fc -> log_softmax, all resident in VMEM, fully batched.
# ---------------------------------------------------------------------------
def _gcn_fused_kernel(x_ref, adj_ref, w1_ref, w2_ref, wfc_ref, bfc_ref, o_ref,
                      *, inv_n, reorder_layer1):
    b_blk, n, d_in = x_ref.shape
    h1_dim = w1_ref.shape[1]
    r = w2_ref.shape[1]

    w1 = w1_ref[...]              # (D_in, H1)
    w2 = w2_ref[...]              # (H1, R)
    wfc = wfc_ref[...]            # (R, C)
    bfc = bfc_ref[...]            # (1, C), f32
    cdt = w1.dtype                # MXU input dtype; accumulation is always f32

    x = x_ref[...]                # (b_blk, N, D_in)
    adj = adj_ref[...]            # (b_blk, N, N)

    # ---- layer 1: relu(adj @ (x @ W1)), cheaper contraction order -----------
    if reorder_layer1:
        # (adj @ x) first (K = D_in < H1), then ONE (b_blk*N, D_in)@(D_in, H1).
        ax = jnp.einsum('bij,bjd->bid', adj, x,
                        preferred_element_type=jnp.float32)
        h1 = jnp.dot(ax.reshape(b_blk * n, d_in).astype(cdt), w1,
                     preferred_element_type=jnp.float32)
    else:
        s1 = jnp.dot(x.reshape(b_blk * n, d_in), w1,
                     preferred_element_type=jnp.float32)
        s1 = s1.reshape(b_blk, n, h1_dim).astype(cdt)
        h1 = jnp.einsum('bij,bjh->bih', adj, s1,
                        preferred_element_type=jnp.float32)
        h1 = h1.reshape(b_blk * n, h1_dim)
    h1 = jnp.maximum(h1, 0.0)                      # f32, (b_blk*N, H1)

    # ---- layer 2: relu(adj @ (h1 @ W2)) --------------------------------------
    s2 = jnp.dot(h1.astype(cdt), w2, preferred_element_type=jnp.float32)
    s2 = s2.reshape(b_blk, n, r).astype(cdt)
    h2 = jnp.maximum(
        jnp.einsum('bij,bjr->bir', adj, s2, preferred_element_type=jnp.float32),
        0.0)                                       # f32, (b_blk, N, R)

    # ---- head, once per block: mean over nodes, fc, log_softmax -------------
    pooled = jnp.sum(h2, axis=1) * inv_n           # f32, (b_blk, R); 1/N in f32
    logits = jnp.dot(pooled.astype(cdt), wfc,
                     preferred_element_type=jnp.float32) + bfc     # (b_blk, C)
    m = jnp.max(logits, axis=-1, keepdims=True)
    z = logits - m
    lse = jnp.log(jnp.sum(jnp.exp(z), axis=-1, keepdims=True))
    o_ref[...] = (z - lse)[:, None, :].astype(o_ref.dtype)


# ---------------------------------------------------------------------------
# Device / sizing helpers
# ---------------------------------------------------------------------------
def _device_profile():
    """Returns (tensorcores_per_chip, VMEM bytes per core)."""
    cores, vmem = 1, 128 * 1024 * 1024
    try:
        kind = jax.devices()[0].device_kind.lower()
    except Exception:
        return cores, vmem
    if "v7" in kind:
        cores, vmem = 2, 64 * 1024 * 1024
    elif ("lite" in kind) or ("v5e" in kind) or ("v6" in kind):
        cores, vmem = 1, 128 * 1024 * 1024
    elif ("v2" in kind) or ("v3" in kind) or ("v4" in kind) or ("v5" in kind):
        cores, vmem = 2, 128 * 1024 * 1024
    return cores, vmem


def _vmem_estimate(b_blk, n, d_in, h1, r, c, in_itemsize):
    io = 2 * b_blk * n * (d_in + n) * in_itemsize          # double-buffered x + adj
    w = 2 * (d_in * h1 + h1 * r + r * c + c) * in_itemsize  # double-buffered weights
    out = 2 * b_blk * c * 4
    inter = b_blk * n * (max(d_in, h1) + h1 + 2 * r) * 4    # f32 temporaries (rough)
    return io + w + out + inter


def _pick_batch_block(batch, n, d_in, h1, r, c, in_itemsize, cores, vmem_bytes):
    """Largest divisor of `batch` whose working set fits the VMEM budget.

    On multi-TC chips keep >= `cores` grid steps so "parallel" can shard;
    on single-TC chips grid=1 is fine (each extra step is pure overhead).
    """
    budget = int(0.75 * vmem_bytes)
    best = 1
    for d in range(1, batch + 1):
        if batch % d:
            continue
        if cores > 1 and batch >= cores and (batch // d) < cores:
            continue
        if _vmem_estimate(d, n, d_in, h1, r, c, in_itemsize) <= budget:
            best = d
    return best


def _nbytes(shape, dtype):
    return int(math.prod(shape)) * jnp.dtype(dtype).itemsize


# ---------------------------------------------------------------------------
# pallas_call wrapper
# ---------------------------------------------------------------------------
def gcn_fused(xf, adjf, w1, w2, wfc, bfc2, *, b_blk=None):
    B, N, D_in = xf.shape
    H1 = w1.shape[1]
    R = w2.shape[1]
    C = wfc.shape[1]
    itemsize = jnp.dtype(xf.dtype).itemsize

    cores, vmem_cap = _device_profile()
    if b_blk is None:
        b_blk = _pick_batch_block(B, N, D_in, H1, R, C, itemsize, cores, vmem_cap)
    assert B % b_blk == 0
    grid = (B // b_blk,)
    reorder_layer1 = D_in < H1

    est = _vmem_estimate(b_blk, N, D_in, H1, R, C, itemsize)
    vmem_limit = int(min(vmem_cap, max(32 * 1024 * 1024, 2 * est)))

    adj_k1 = D_in if reorder_layer1 else H1
    flops = 2 * B * (N * N * adj_k1     # layer-1 adjacency contraction
                     + N * D_in * H1    # layer-1 weight matmul
                     + N * H1 * R       # layer-2 weight matmul
                     + N * N * R        # layer-2 adjacency contraction
                     + N * R            # pooling
                     + R * C)           # fc
    bytes_accessed = (_nbytes(xf.shape, xf.dtype) + _nbytes(adjf.shape, adjf.dtype)
                      + _nbytes(w1.shape, w1.dtype) + _nbytes(w2.shape, w2.dtype)
                      + _nbytes(wfc.shape, wfc.dtype) + _nbytes(bfc2.shape, bfc2.dtype)
                      + _nbytes((B, C), jnp.float32))
    cost = pl.CostEstimate(flops=int(flops),
                           transcendentals=int(B * (C + 1)),
                           bytes_accessed=int(bytes_accessed))

    kernel = functools.partial(_gcn_fused_kernel, inv_n=1.0 / N,
                               reorder_layer1=reorder_layer1)

    out3 = pl.pallas_call(
        kernel,
        out_shape=jax.ShapeDtypeStruct((B, 1, C), jnp.float32),
        grid=grid,
        in_specs=[
            pl.BlockSpec((b_blk, N, D_in), lambda b: (b, 0, 0)),
            pl.BlockSpec((b_blk, N, N), lambda b: (b, 0, 0)),
            # Constant index_maps: weights are DMA'd once and stay resident.
            pl.BlockSpec((D_in, H1), lambda b: (0, 0)),
            pl.BlockSpec((H1, R), lambda b: (0, 0)),
            pl.BlockSpec((R, C), lambda b: (0, 0)),
            pl.BlockSpec((1, C), lambda b: (0, 0)),
        ],
        out_specs=pl.BlockSpec((b_blk, 1, C), lambda b: (b, 0, 0)),
        compiler_params=pltpu.CompilerParams(
            dimension_semantics=("parallel",),
            vmem_limit_bytes=vmem_limit),
        cost_estimate=cost,
    )(xf, adjf, w1, w2, wfc, bfc2)
    return out3.reshape(B, C)


# ---------------------------------------------------------------------------
# Full forward (glue in plain JAX, hot path in the fused kernel above)
# ---------------------------------------------------------------------------
def gcn_forward(params, x, adj, *, compute_dtype=jnp.float32):
    B = x.shape[0]
    N = params["num_nodes"]
    xf = x.reshape(B, N, -1).astype(compute_dtype)   # matches torch x.view(B, N, -1)
    adjf = adj.astype(compute_dtype)
    w1 = params["w1"].astype(compute_dtype)
    w2 = params["w2"].astype(compute_dtype)
    wfc = params["w_fc"].astype(compute_dtype)
    bfc2 = params["b_fc"].reshape(1, -1).astype(jnp.float32)
    return gcn_fused(xf, adjf, w1, w2, wfc, bfc2)


# Pure-JAX reference for correctness checking.
def gcn_forward_ref(params, x, adj):
    B = x.shape[0]
    N = params["num_nodes"]
    xf = x.reshape(B, N, -1).astype(jnp.float32)
    adjf = adj.astype(jnp.float32)
    h = jnp.maximum(adjf @ (xf @ params["w1"]), 0.0)
    h = jnp.maximum(adjf @ (h @ params["w2"]), 0.0)
    pooled = jnp.mean(h, axis=1)
    logits = pooled @ params["w_fc"] + params["b_fc"]
    return jax.nn.log_softmax(logits, axis=1)


def _xavier_uniform(key, shape):
    fan_in, fan_out = shape[0], shape[1]
    limit = jnp.sqrt(6.0 / (fan_in + fan_out))
    return jax.random.uniform(key, shape, jnp.float32, -limit, limit)


def init_params(key, *, num_nodes, seq_len, input_dim, rnn_units, num_classes):
    d_in = seq_len * input_dim
    k1, k2, k3, k4 = jax.random.split(key, 4)
    # conv1: GCNLayer(seq_len*input_dim, 512); conv2: GCNLayer(512, rnn_units)
    w1 = _xavier_uniform(k1, (d_in, 512))
    w2 = _xavier_uniform(k2, (512, rnn_units))
    # fc: Linear(rnn_units, num_classes) -> store transposed weight (R, C)
    bound = 1.0 / jnp.sqrt(rnn_units)
    w_fc = jax.random.uniform(k3, (rnn_units, num_classes), jnp.float32,
                              -bound, bound)
    b_fc = jax.random.uniform(k4, (num_classes,), jnp.float32, -bound, bound)
    return {"w1": w1, "w2": w2, "w_fc": w_fc, "b_fc": b_fc,
            "num_nodes": num_nodes}


if __name__ == "__main__":
    # Small, module-consistent shapes.
    B, num_nodes, seq_len, input_dim = 2, 8, 8, 4
    rnn_units, num_classes = 32, 4

    key = jax.random.PRNGKey(0)
    kp, kx, ka = jax.random.split(key, 3)

    params = init_params(kp, num_nodes=num_nodes, seq_len=seq_len,
                         input_dim=input_dim, rnn_units=rnn_units,
                         num_classes=num_classes)

    x = jax.random.normal(kx, (B, num_nodes, seq_len, input_dim), jnp.float32)
    # Dense (row-normalized) adjacency per batch element.
    adj_raw = jax.random.uniform(ka, (B, num_nodes, num_nodes), jnp.float32)
    adj = adj_raw / jnp.sum(adj_raw, axis=-1, keepdims=True)

    ref = gcn_forward_ref(params, x, adj)

    # f32 path (default).
    out = jax.block_until_ready(gcn_forward(params, x, adj))
    assert out.shape == (B, num_classes)
    assert jnp.allclose(out, ref, atol=2e-3, rtol=2e-3), "f32 mismatch vs reference"

    # bf16 MXU-input path (f32 accumulation + f32 elementwise) — looser tolerance.
    out_bf16 = jax.block_until_ready(
        gcn_forward(params, x, adj, compute_dtype=jnp.bfloat16))
    assert jnp.allclose(out_bf16, ref, atol=5e-2, rtol=5e-2), "bf16 mismatch vs reference"

    print("KERNEL_OK")
</pallas_src>

<mosaic_0001>
module attributes {stable_mosaic.version = 11 : i64} {
  func.func @_gcn_fused_kernel(%arg0: i32, %arg1: memref<2x8x32xf32, #tpu.memory_space<vmem>>, %arg2: memref<2x8x8xf32, #tpu.memory_space<vmem>>, %arg3: memref<32x512xf32, #tpu.memory_space<vmem>>, %arg4: memref<512x32xf32, #tpu.memory_space<vmem>>, %arg5: memref<32x4xf32, #tpu.memory_space<vmem>>, %arg6: memref<1x4xf32, #tpu.memory_space<vmem>>, %arg7: memref<2x1x4xf32, #tpu.memory_space<vmem>>) attributes {dimension_semantics = [#tpu.dimension_semantics<parallel>], iteration_bounds = array<i64: 1>, scalar_prefetch = 0 : i64, scratch_operands = 0 : i64, tpu.core_type = #tpu.core_type<tc>, window_params = [{transform_indices = @transform_0, window_bounds = array<i64: 2, 8, 32>}, {transform_indices = @transform_1, window_bounds = array<i64: 2, 8, 8>}, {pipeline_mode = #tpu.pipeline_mode<synchronous>, transform_indices = @transform_2, window_bounds = array<i64: 32, 512>}, {pipeline_mode = #tpu.pipeline_mode<synchronous>, transform_indices = @transform_3, window_bounds = array<i64: 512, 32>}, {pipeline_mode = #tpu.pipeline_mode<synchronous>, transform_indices = @transform_4, window_bounds = array<i64: 32, 4>}, {pipeline_mode = #tpu.pipeline_mode<synchronous>, transform_indices = @transform_5, window_bounds = array<i64: 1, 4>}, {transform_indices = @transform_6, window_bounds = array<i64: 2, 1, 4>}]} {
    %c0 = arith.constant 0 : index
    %c0_0 = arith.constant 0 : index
    %0 = vector.load %arg3[%c0, %c0_0] : memref<32x512xf32, #tpu.memory_space<vmem>>, vector<32x512xf32>
    %c0_1 = arith.constant 0 : index
    %c0_2 = arith.constant 0 : index
    %1 = vector.load %arg4[%c0_1, %c0_2] : memref<512x32xf32, #tpu.memory_space<vmem>>, vector<512x32xf32>
    %c0_3 = arith.constant 0 : index
    %c0_4 = arith.constant 0 : index
    %2 = vector.load %arg5[%c0_3, %c0_4] : memref<32x4xf32, #tpu.memory_space<vmem>>, vector<32x4xf32>
    %c0_5 = arith.constant 0 : index
    %c0_6 = arith.constant 0 : index
    %3 = vector.load %arg6[%c0_5, %c0_6] : memref<1x4xf32, #tpu.memory_space<vmem>>, vector<1x4xf32>
    %c0_7 = arith.constant 0 : index
    %c0_8 = arith.constant 0 : index
    %c0_9 = arith.constant 0 : index
    %4 = vector.load %arg1[%c0_7, %c0_8, %c0_9] : memref<2x8x32xf32, #tpu.memory_space<vmem>>, vector<2x8x32xf32>
    %c0_10 = arith.constant 0 : index
    %c0_11 = arith.constant 0 : index
    %c0_12 = arith.constant 0 : index
    %5 = vector.load %arg2[%c0_10, %c0_11, %c0_12] : memref<2x8x8xf32, #tpu.memory_space<vmem>>, vector<2x8x8xf32>
    "tpu.trace_start"() <{level = 10 : i32, message = "bij,bjd->bid"}> : () -> ()
    %cst = arith.constant dense<0.000000e+00> : vector<2x8x32xf32>
    %6 = tpu.matmul %5, %4, %cst {dimension_numbers = #tpu.dot_dimension_numbers<[2], [1], [1], [2], [0, 0, 0, 1, 1, 2], [0], [0]>} : vector<2x8x8xf32>, vector<2x8x32xf32>, vector<2x8x32xf32> -> vector<2x8x32xf32>
    "tpu.trace_stop"() : () -> ()
    %7 = vector.shape_cast %6 : vector<2x8x32xf32> to vector<16x32xf32>
    %cst_13 = arith.constant dense<0.000000e+00> : vector<16x512xf32>
    %8 = tpu.matmul %7, %0, %cst_13 {dimension_numbers = #tpu.dot_dimension_numbers<[1], [0], [0], [1], [0, 0, 1, 1], [], []>} : vector<16x32xf32>, vector<32x512xf32>, vector<16x512xf32> -> vector<16x512xf32>
    %cst_14 = arith.constant 0.000000e+00 : f32
    %9 = vector.broadcast %cst_14 : f32 to vector<16x512xf32>
    %10 = arith.maximumf %8, %9 : vector<16x512xf32>
    %cst_15 = arith.constant dense<0.000000e+00> : vector<16x32xf32>
    %11 = tpu.matmul %10, %1, %cst_15 {dimension_numbers = #tpu.dot_dimension_numbers<[1], [0], [0], [1], [0, 0, 1, 1], [], []>} : vector<16x512xf32>, vector<512x32xf32>, vector<16x32xf32> -> vector<16x32xf32>
    %12 = vector.shape_cast %11 : vector<16x32xf32> to vector<2x8x32xf32>
    "tpu.trace_start"() <{level = 10 : i32, message = "bij,bjr->bir"}> : () -> ()
    %cst_16 = arith.constant dense<0.000000e+00> : vector<2x8x32xf32>
    %13 = tpu.matmul %5, %12, %cst_16 {dimension_numbers = #tpu.dot_dimension_numbers<[2], [1], [1], [2], [0, 0, 0, 1, 1, 2], [0], [0]>} : vector<2x8x8xf32>, vector<2x8x32xf32>, vector<2x8x32xf32> -> vector<2x8x32xf32>
    "tpu.trace_stop"() : () -> ()
    %cst_17 = arith.constant 0.000000e+00 : f32
    %14 = vector.broadcast %cst_17 : f32 to vector<2x8x32xf32>
    %15 = arith.maximumf %13, %14 : vector<2x8x32xf32>
    %cst_18 = arith.constant dense<0.000000e+00> : vector<2x32xf32>
    %16 = vector.multi_reduction <add>, %15, %cst_18 [1] : vector<2x8x32xf32> to vector<2x32xf32>
    %cst_19 = arith.constant 1.250000e-01 : f32
    %17 = vector.broadcast %cst_19 : f32 to vector<2x32xf32>
    %18 = arith.mulf %16, %17 : vector<2x32xf32>
    %cst_20 = arith.constant dense<0.000000e+00> : vector<2x4xf32>
    %19 = tpu.matmul %18, %2, %cst_20 {dimension_numbers = #tpu.dot_dimension_numbers<[1], [0], [0], [1], [0, 0, 1, 1], [], []>} : vector<2x32xf32>, vector<32x4xf32>, vector<2x4xf32> -> vector<2x4xf32>
    %20 = vector.broadcast %3 : vector<1x4xf32> to vector<2x4xf32>
    %21 = arith.addf %19, %20 : vector<2x4xf32>
    %cst_21 = arith.constant dense<0xFF800000> : vector<2xf32>
    %22 = vector.multi_reduction <maximumf>, %21, %cst_21 [1] : vector<2x4xf32> to vector<2xf32>
    %23 = vector.shape_cast %22 : vector<2xf32> to vector<2x1xf32>
    %24 = vector.broadcast %23 : vector<2x1xf32> to vector<2x4xf32>
    %25 = arith.subf %21, %24 : vector<2x4xf32>
    %26 = math.exp %25 : vector<2x4xf32>
    %cst_22 = arith.constant dense<0.000000e+00> : vector<2xf32>
    %27 = vector.multi_reduction <add>, %26, %cst_22 [1] : vector<2x4xf32> to vector<2xf32>
    %28 = vector.shape_cast %27 : vector<2xf32> to vector<2x1xf32>
    %29 = math.log %28 : vector<2x1xf32>
    %30 = vector.broadcast %29 : vector<2x1xf32> to vector<2x4xf32>
    %31 = arith.subf %25, %30 : vector<2x4xf32>
    %32 = vector.shape_cast %31 : vector<2x4xf32> to vector<2x1x4xf32>
    %c0_23 = arith.constant 0 : index
    %c0_24 = arith.constant 0 : index
    %c0_25 = arith.constant 0 : index
    %33 = vector.load %arg7[%c0_23, %c0_24, %c0_25] : memref<2x1x4xf32, #tpu.memory_space<vmem>>, vector<2x1x4xf32>
    tpu.vector_store %arg7[%c0_23, %c0_24, %c0_25], %32 {strides = array<i32>} : memref<2x1x4xf32, #tpu.memory_space<vmem>>, vector<2x1x4xf32>,
    return
  }
  func.func @transform_0(%arg0: i32) -> (i32, i32, i32) {
    %c0_i32 = arith.constant 0 : i32
    %c0_i32_0 = arith.constant 0 : i32
    %c0_i32_1 = arith.constant 0 : i32
    return %arg0, %c0_i32, %c0_i32_0 : i32, i32, i32
  }
  func.func @transform_1(%arg0: i32) -> (i32, i32, i32) {
    %c0_i32 = arith.constant 0 : i32
    %c0_i32_0 = arith.constant 0 : i32
    %c0_i32_1 = arith.constant 0 : i32
    return %arg0, %c0_i32, %c0_i32_0 : i32, i32, i32
  }
  func.func @transform_2(%arg0: i32) -> (i32, i32) {
    %c0_i32 = arith.constant 0 : i32
    %c0_i32_0 = arith.constant 0 : i32
    %c0_i32_1 = arith.constant 0 : i32
    return %c0_i32, %c0_i32_0 : i32, i32
  }
  func.func @transform_3(%arg0: i32) -> (i32, i32) {
    %c0_i32 = arith.constant 0 : i32
    %c0_i32_0 = arith.constant 0 : i32
    %c0_i32_1 = arith.constant 0 : i32
    return %c0_i32, %c0_i32_0 : i32, i32
  }
  func.func @transform_4(%arg0: i32) -> (i32, i32) {
    %c0_i32 = arith.constant 0 : i32
    %c0_i32_0 = arith.constant 0 : i32
    %c0_i32_1 = arith.constant 0 : i32
    return %c0_i32, %c0_i32_0 : i32, i32
  }
  func.func @transform_5(%arg0: i32) -> (i32, i32) {
    %c0_i32 = arith.constant 0 : i32
    %c0_i32_0 = arith.constant 0 : i32
    %c0_i32_1 = arith.constant 0 : i32
    return %c0_i32, %c0_i32_0 : i32, i32
  }
  func.func @transform_6(%arg0: i32) -> (i32, i32, i32) {
    %c0_i32 = arith.constant 0 : i32
    %c0_i32_0 = arith.constant 0 : i32
    %c0_i32_1 = arith.constant 0 : i32
    return %arg0, %c0_i32, %c0_i32_0 : i32, i32, i32
  }
}

</mosaic_0001>

<bundles_post_ra>
// kernel: tpu_custom_call.1
= control target key start
LH: loop header
LB: loop body
LE: loop exit
PB: predicated region body
PF: predicated region fallthrough
CT: control target
= control target key end

     0   :  { %vm113_vm0 = vcmask 64512   ;;  %v1127_v3 = vmov 0.0   ;;  %vm1128_vm1 = vmmov 0   ;;  %s1485_s0 = inlined_call_operand.vmem [shape: f32[2,8,32], index: 0, kind: input, shape index: {}]   ;;  %s1486_s1 = inlined_call_operand.vmem [shape: f32[2,8,8], index: 1, kind: input, shape index: {}]   ;;  %s1487_s2 = inlined_call_operand.vmem [shape: f32[32,512], index: 2, kind: input, shape index: {}]   ;;  %s1488_s3 = inlined_call_operand.vmem [shape: f32[512,32], index: 3, kind: input, shape index: {}]   ;;  %s1489_s4 = inlined_call_operand.vmem [shape: f32[32,4], index: 4, kind: input, shape index: {}]   ;;  %s1490_s5 = inlined_call_operand.vmem [shape: f32[1,4], index: 5, kind: input, shape index: {}]   ;;  %s1491_s6 = inlined_call_operand.hbm [shape: f32[2,1,4], index: 6, kind: output, shape index: {}]  }
   0x1   :  { %v109_v0 = vld [vmem:[%s1485_s0] sm:$0xff]  ;;  %v110_v2 = vld [vmem:[%s1485_s0 + $0x8] sm:$0xff]  ;;  %975 = vmatprep.subr.mxu0 %v1127_v3  ;;  %977 = vmatprep.mubr.msk.f32.mxu0 %vm1128_vm1, %v1127_v3  ;;  %v27_v8 = vld [vmem:[%s1487_s2 + $0x18] sm:$0xff] }
   0x2   :  { %v1175_v1 = vld [vmem:[%s1486_s1] sm:$0xff]  ;;  %v1186_v4 = vld [vmem:[%s1486_s1 + $0x8] sm:$0xff]  ;;  %976 = vmatpush3.msra.mxu0 %v109_v0  ;;  %980 = vmatprep.subr.mxu1 %v1127_v3  ;;  %v31_v9 = vld [vmem:[%s1487_s2 + $0x38] sm:$0xff] }
   0x3   :  { %v25_v5 = vld [vmem:[%s1487_s2 + $0x8] sm:$0xff]  ;;  %v24_v10 = vld [vmem:[%s1487_s2] sm:$0xff]  ;;  %978 = vmatmul.mubr.msk.f32.vlgmr.msra.gmra.mrb[0].mxu0 %vm113_vm0, %v1175_v1  ;;  %981 = vmatpush3.msra.mxu1 %v110_v2  ;;  %v1014_v11 = vpack.c.bf16 %v31_v9, %v27_v8  ;;  %v26_v13 = vld [vmem:[%s1487_s2 + $0x10] sm:$0xff] }
   0x4   :  { %v29_v6 = vld [vmem:[%s1487_s2 + $0x28] sm:$0xff]  ;;  %v28_v12 = vld [vmem:[%s1487_s2 + $0x20] sm:$0xff]  ;;  %v30_v14 = vld [vmem:[%s1487_s2 + $0x30] sm:$0xff]  ;;  %982 = vmatprep.mubr.msk.f32.mxu1 %vm1128_vm1, %v1127_v3 }
   0x5   :  { %v1006_v7 = vpack.c.bf16 %v29_v6, %v25_v5  ;;  %v1008_v15 = vpack.c.bf16 %v28_v12, %v24_v10  ;;  %v1016_v16 = vpack.c.bf16 %v30_v14, %v26_v13  ;;  %v33_v17 = vld [vmem:[%s1487_s2 + $0x48] sm:$0xff]  ;;  %v35_v19 = vld [vmem:[%s1487_s2 + $0x58] sm:$0xff]  ;;  %983 = vmatmul.mubr.msk.f32.vlgmr.msra.gmra.mrb[0].mxu1 %vm113_vm0, %v1186_v4  ;;  %1015 = vmatprep.subr.bf16.mxu1 %v1014_v11  ;;  %v32_v22 = vld [vmem:[%s1487_s2 + $0x40] sm:$0xff] }
   0x6   :  { %v37_v18 = vld [vmem:[%s1487_s2 + $0x68] sm:$0xff]  ;;  %v39_v21 = vld [vmem:[%s1487_s2 + $0x78] sm:$0xff]  ;;  %v36_v23 = vld [vmem:[%s1487_s2 + $0x60] sm:$0xff] }
   0x7   :  { %1007 = vmatprep.subr.bf16.mxu0 %v1006_v7  ;;  %v1010_v20 = vpack.c.bf16 %v37_v18, %v33_v17  ;;  %1017 = vmatpush1.bf16.msra.mxu1 %v1016_v16  ;;  %v1018_v24 = vpack.c.bf16 %v39_v21, %v35_v19  ;;  %v1012_v25 = vpack.c.bf16 %v36_v23, %v32_v22  ;;  %v34_v26 = vld [vmem:[%s1487_s2 + $0x50] sm:$0xff] }
   0x8   :  { %1009 = vmatpush1.bf16.msra.mxu0 %v1008_v15  ;;  %v38_v27 = vld [vmem:[%s1487_s2 + $0x70] sm:$0xff] }
   0x9   :  { %11 = vsyncpa [#allocation3], 0  ;;  %1011 = vmatprep.subr.bf16.mxu0 %v1010_v20  ;;  %v1020_v28 = vpack.c.bf16 %v38_v27, %v34_v26  ;;  %331 = vmatprep.mubr.f32.mxu0 %v1127_v3  ;;  %v56_v29 = vld [vmem:[%s1488_s3 + $0x80] sm:$0xff]  ;;  %v57_v30 = vld [vmem:[%s1488_s3 + $0x88] sm:$0xff]  ;;  %vm260_vm2 = vcmask 261120   ;;  %vm745_vm3 = vcmask 1041409  }
   0xa   :  { %1019 = vmatprep.subr.bf16.mxu1 %v1018_v24  ;;  %408 = vmatprep.mubr.f32.mxu1 %v1127_v3  ;;  %v88_v31 = vld [vmem:[%s1488_s3 + $0x180] sm:$0xff]  ;;  %v1022_v32 = vpack.c.bf16 %v57_v30, %v56_v29  ;;  %v89_v33 = vld [vmem:[%s1488_s3 + $0x188] sm:$0xff]  ;;  %v58_v39 = vld [vmem:[%s1488_s3 + $0x90] sm:$0xff]  ;;  %vm819_vm4 = vcmask 25600   ;;  %vm857_vm5 = vcmask 24576  }
   0xb   :  { %1021 = vmatpush1.bf16.msra.mxu1 %v1020_v28  ;;  %v1054_v34 = vpack.c.bf16 %v89_v33, %v88_v31  ;;  %v40_v35 = vld [vmem:[%s1488_s3] sm:$0xff]  ;;  %v41_v36 = vld [vmem:[%s1488_s3 + $0x8] sm:$0xff]  ;;  %v59_v40 = vld [vmem:[%s1488_s3 + $0x98] sm:$0xff] }
   0xc   :  { %1013 = vmatpush1.bf16.msra.mxu0 %v1012_v25  ;;  %v72_v37 = vld [vmem:[%s1488_s3 + $0x100] sm:$0xff]  ;;  %v73_v38 = vld [vmem:[%s1488_s3 + $0x108] sm:$0xff]  ;;  %v90_v41 = vld [vmem:[%s1488_s3 + $0x190] sm:$0xff]  ;;  %v1024_v43 = vpack.c.bf16 %v41_v36, %v40_v35  ;;  %v1026_v48 = vpack.c.bf16 %v59_v40, %v58_v39 }
   0xd   :  { %1023 = vmatprep.subr.bf16.mxu0 %v1022_v32  ;;  %1055 = vmatprep.subr.bf16.mxu1 %v1054_v34  ;;  %v91_v42 = vld [vmem:[%s1488_s3 + $0x198] sm:$0xff]  ;;  %v1056_v44 = vpack.c.bf16 %v73_v38, %v72_v37  ;;  %v42_v45 = vld [vmem:[%s1488_s3 + $0x10] sm:$0xff]  ;;  %v60_v52 = vld [vmem:[%s1488_s3 + $0xa0] sm:$0xff] }
   0xe   :  { %v43_v46 = vld [vmem:[%s1488_s3 + $0x18] sm:$0xff]  ;;  %v1058_v49 = vpack.c.bf16 %v91_v42, %v90_v41  ;;  %v74_v50 = vld [vmem:[%s1488_s3 + $0x110] sm:$0xff]  ;;  %v61_v54 = vld [vmem:[%s1488_s3 + $0xa8] sm:$0xff] }
   0xf   :  { %v75_v51 = vld [vmem:[%s1488_s3 + $0x118] sm:$0xff]  ;;  %v92_v55 = vld [vmem:[%s1488_s3 + $0x1a0] sm:$0xff]  ;;  %v93_v56 = vld [vmem:[%s1488_s3 + $0x1a8] sm:$0xff]  ;;  %v1028_v59 = vpack.c.bf16 %v43_v46, %v42_v45  ;;  %v1030_v63 = vpack.c.bf16 %v61_v54, %v60_v52 }
  0x10   :  { %v1060_v60 = vpack.c.bf16 %v75_v51, %v74_v50  ;;  %v44_v61 = vld [vmem:[%s1488_s3 + $0x20] sm:$0xff]  ;;  %v45_v62 = vld [vmem:[%s1488_s3 + $0x28] sm:$0xff]  ;;  %v1062_v0 = vpack.c.bf16 %v93_v56, %v92_v55  ;;  %v62_v6 = vld [vmem:[%s1488_s3 + $0xb0] sm:$0xff] }
  0x11   :  { %v76_v2 = vld [vmem:[%s1488_s3 + $0x120] sm:$0xff]  ;;  %v77_v5 = vld [vmem:[%s1488_s3 + $0x128] sm:$0xff]  ;;  %v63_v7 = vld [vmem:[%s1488_s3 + $0xb8] sm:$0xff]  ;;  %v1032_v10 = vpack.c.bf16 %v45_v62, %v44_v61 }
  0x12   :  { %v94_v8 = vld [vmem:[%s1488_s3 + $0x1b0] sm:$0xff]  ;;  %v95_v9 = vld [vmem:[%s1488_s3 + $0x1b8] sm:$0xff]  ;;  %v1064_v11 = vpack.c.bf16 %v77_v5, %v76_v2  ;;  %v1034_v14 = vpack.c.bf16 %v63_v7, %v62_v6  ;;  %v64_v18 = vld [vmem:[%s1488_s3 + $0xc0] sm:$0xff] }
  0x13   :  { %v46_v12 = vld [vmem:[%s1488_s3 + $0x30] sm:$0xff]  ;;  %v47_v13 = vld [vmem:[%s1488_s3 + $0x38] sm:$0xff]  ;;  %v1066_v15 = vpack.c.bf16 %v95_v9, %v94_v8  ;;  %v65_v19 = vld [vmem:[%s1488_s3 + $0xc8] sm:$0xff] }
  0x14   :  { %v78_v16 = vld [vmem:[%s1488_s3 + $0x130] sm:$0xff]  ;;  %v79_v17 = vld [vmem:[%s1488_s3 + $0x138] sm:$0xff]  ;;  %v96_v20 = vld [vmem:[%s1488_s3 + $0x1c0] sm:$0xff]  ;;  %v1036_v22 = vpack.c.bf16 %v47_v13, %v46_v12  ;;  %v1038_v26 = vpack.c.bf16 %v65_v19, %v64_v18 }
  0x15   :  { %v97_v21 = vld [vmem:[%s1488_s3 + $0x1c8] sm:$0xff]  ;;  %v1068_v23 = vpack.c.bf16 %v79_v17, %v78_v16  ;;  %v48_v24 = vld [vmem:[%s1488_s3 + $0x40] sm:$0xff]  ;;  %v66_v30 = vld [vmem:[%s1488_s3 + $0xd0] sm:$0xff] }
  0x16   :  { %v49_v25 = vld [vmem:[%s1488_s3 + $0x48] sm:$0xff]  ;;  %v1070_v27 = vpack.c.bf16 %v97_v21, %v96_v20  ;;  %v80_v28 = vld [vmem:[%s1488_s3 + $0x140] sm:$0xff]  ;;  %v67_v31 = vld [vmem:[%s1488_s3 + $0xd8] sm:$0xff] }
  0x17   :  { %v81_v29 = vld [vmem:[%s1488_s3 + $0x148] sm:$0xff]  ;;  %v98_v32 = vld [vmem:[%s1488_s3 + $0x1d0] sm:$0xff]  ;;  %v99_v33 = vld [vmem:[%s1488_s3 + $0x1d8] sm:$0xff]  ;;  %v1040_v34 = vpack.c.bf16 %v49_v25, %v48_v24  ;;  %v1042_v38 = vpack.c.bf16 %v67_v31, %v66_v30 }
  0x18   :  { %v1072_v35 = vpack.c.bf16 %v81_v29, %v80_v28  ;;  %v50_v36 = vld [vmem:[%s1488_s3 + $0x50] sm:$0xff]  ;;  %v51_v37 = vld [vmem:[%s1488_s3 + $0x58] sm:$0xff]  ;;  %v1074_v39 = vpack.c.bf16 %v99_v33, %v98_v32  ;;  %v68_v42 = vld [vmem:[%s1488_s3 + $0xe0] sm:$0xff] }
  0x19   :  { %v82_v40 = vld [vmem:[%s1488_s3 + $0x150] sm:$0xff]  ;;  %v83_v41 = vld [vmem:[%s1488_s3 + $0x158] sm:$0xff]  ;;  %v101_v45 = vld [vmem:[%s1488_s3 + $0x1e8] sm:$0xff]  ;;  %v1044_v46 = vpack.c.bf16 %v51_v37, %v50_v36 }
  0x1a   :  { %v53_v51 = vld [vmem:[%s1488_s3 + $0x68] sm:$0xff]  ;;  %v84_v52 = vld [vmem:[%s1488_s3 + $0x160] sm:$0xff]  ;;  %v70_v56 = vld [vmem:[%s1488_s3 + $0xf0] sm:$0xff] }
  0x1b   :  { %v54_v61 = vld [vmem:[%s1488_s3 + $0x70] sm:$0xff]  ;;  %v55_v62 = vld [vmem:[%s1488_s3 + $0x78] sm:$0xff]  ;;  %v104_v37 = vld [vmem:[%s1489_s4] sm:$0xff] }
  0x1c   :  { %v86_v2 = vld [vmem:[%s1488_s3 + $0x170] sm:$0xff]  ;;  %v87_v5 = vld [vmem:[%s1488_s3 + $0x178] sm:$0xff] }
  0x1d   :  { %v1084_v6 = vpack.c.bf16 %v87_v5, %v86_v2 }
  0xd6   :  { %v183_v47 = vpop.f32.mrb[0].mxu0 }
  0xd7   :  { %v979_v53 = vpop.f32.mrb[1].mxu0  ;;  %878 = vmatmul.mubr.msk.f32.vlgmr.msra.gmra.mrb[2].mxu0 %vm260_vm2, %v183_v47  ;;  %880 = vmatmul.mubr.msk.f32.vlgmr.msra.gmra.mrb[2].mxu1 %vm260_vm2, %v183_v47  ;;  %v1076_v47 = vpack.c.bf16 %v83_v41, %v82_v40 }
  0xd8   :  { %v256_v57 = vpop.f32.mrb[0].mxu1  ;;  %337 = vmatprep.mubr.f32.mxu0 %v1127_v3  ;;  %414 = vmatprep.mubr.f32.mxu1 %v1127_v3  ;;  %v85_v53 = vld [vmem:[%s1488_s3 + $0x168] sm:$0xff] }
  0xd9   :  { %v984_v58 = vpop.f32.mrb[1].mxu1  ;;  %1025 = vmatpush3.bf16.msra.mxu0 %v1024_v43  ;;  %1057 = vmatpush3.bf16.msra.mxu1 %v1056_v44  ;;  %v69_v43 = vld [vmem:[%s1488_s3 + $0xe8] sm:$0xff]  ;;  %v100_v44 = vld [vmem:[%s1488_s3 + $0x1e0] sm:$0xff]  ;;  %v1080_v55 = vpack.c.bf16 %v85_v53, %v84_v52 }
  0xda   :  { %1027 = vmatprep.subr.bf16.mxu0 %v1026_v48  ;;  %1059 = vmatprep.subr.bf16.mxu1 %v1058_v49  ;;  %v52_v48 = vld [vmem:[%s1488_s3 + $0x60] sm:$0xff]  ;;  %v1046_v49 = vpack.c.bf16 %v69_v43, %v68_v42  ;;  %v1078_v50 = vpack.c.bf16 %v101_v45, %v100_v44  ;;  %v102_v58 = vld [vmem:[%s1488_s3 + $0x1f0] sm:$0xff] }
  0xdb   :  { %879 = vmatmul.mubr.msk.f32.gmra.mrb[4].mxu0 %vm260_vm2, %v256_v57  ;;  %881 = vmatmul.mubr.msk.f32.gmra.mrb[4].mxu1 %vm260_vm2, %v256_v57  ;;  %v1048_v54 = vpack.c.bf16 %v53_v51, %v52_v48  ;;  %v71_v57 = vld [vmem:[%s1488_s3 + $0xf8] sm:$0xff] }
  0xdd   :  { %1029 = vmatpush3.bf16.msra.mxu0 %v1028_v59  ;;  %1061 = vmatpush3.bf16.msra.mxu1 %v1060_v60  ;;  %v1050_v59 = vpack.c.bf16 %v71_v57, %v70_v56  ;;  %v103_v60 = vld [vmem:[%s1488_s3 + $0x1f8] sm:$0xff] }
  0xde   :  { %1031 = vmatprep.subr.bf16.mxu0 %v1030_v63  ;;  %1063 = vmatprep.subr.bf16.mxu1 %v1062_v0  ;;  %v1082_v63 = vpack.c.bf16 %v103_v60, %v102_v58  ;;  %v1052_v0 = vpack.c.bf16 %v55_v62, %v54_v61 }
  0xe1   :  { %1033 = vmatpush3.bf16.msra.mxu0 %v1032_v10  ;;  %1065 = vmatpush3.bf16.msra.mxu1 %v1064_v11 }
  0xe2   :  { %1035 = vmatprep.subr.bf16.mxu0 %v1034_v14  ;;  %1067 = vmatprep.subr.bf16.mxu1 %v1066_v15 }
  0xe5   :  { %1037 = vmatpush3.bf16.msra.mxu0 %v1036_v22  ;;  %1069 = vmatpush3.bf16.msra.mxu1 %v1068_v23 }
  0xe6   :  { %1039 = vmatprep.subr.bf16.mxu0 %v1038_v26  ;;  %1071 = vmatprep.subr.bf16.mxu1 %v1070_v27 }
  0xe9   :  { %1041 = vmatpush3.bf16.msra.mxu0 %v1040_v34  ;;  %1073 = vmatpush3.bf16.msra.mxu1 %v1072_v35 }
  0xea   :  { %1043 = vmatprep.subr.bf16.mxu0 %v1042_v38  ;;  %1075 = vmatprep.subr.bf16.mxu1 %v1074_v39  ;;  %v105_v38 = vld [vmem:[%s1489_s4 + $0x8] sm:$0xff] }
  0xeb   :  { %v1087_v39 = vpack.c.bf16 %v105_v38, %v104_v37 }
  0xed   :  { %1045 = vmatpush3.bf16.msra.mxu0 %v1044_v46  ;;  %1077 = vmatpush3.bf16.msra.mxu1 %v1076_v47 }
  0xee   :  { %1047 = vmatprep.subr.bf16.mxu0 %v1046_v49  ;;  %1079 = vmatprep.subr.bf16.mxu1 %v1078_v50 }
  0xf1   :  { %1049 = vmatpush3.bf16.msra.mxu0 %v1048_v54  ;;  %1081 = vmatpush3.bf16.msra.mxu1 %v1080_v55 }
  0xf2   :  { %1051 = vmatprep.subr.bf16.mxu0 %v1050_v59  ;;  %1083 = vmatprep.subr.bf16.mxu1 %v1082_v63 }
  0xf5   :  { %1053 = vmatpush3.bf16.msra.mxu0 %v1052_v0  ;;  %1085 = vmatpush3.bf16.msra.mxu1 %v1084_v6  ;;  %v884_v0 = vld [vmem:[%s1490_s5] ss:$0 sm:$0xff]  ;;  %s1131_s5 = smov [#allocation2]  }
  0xf6   :  { %985 = vmatprep.subr.mxu1 %v1127_v3  ;;  %s865_s11 = sshll.u32 %s1131_s5, 4  ;;  %s866_s11 = int_to_ptr.vmem [resolvable:$true] %s865_s11 }
  0xf7   :  { %s1103_s1 = scalar_lea.vmem %s866_s11, 32  ;;  %p1108_p1 = scmp.lt.s32.totalorder %s866_s11, %s866_s11 }
  0xf8   :  { %p1104_p0 = scmp.ne.s32.totalorder %s866_s11, %s1103_s1  ;;  %p1109_p2 = scmp.lt.s32.totalorder %s1103_s1, %s1103_s1 }
  0xfa   :  { %p1110_p3 = por %p1109_p2, %p1108_p1 }
  0xfc   :  { %p1111_p4 = pnand %p1110_p3, %p1104_p0 }
 0x1aa   :  { %v333_v7 = vpop.f32.mrb[2].mxu0  ;;  %v410_v8 = vpop.f32.mrb[2].mxu1 }
 0x1ab   :  { %v335_v9 = vpop.f32.mrb[3].mxu0  ;;  %v412_v10 = vpop.f32.mrb[3].mxu1  ;;  %v421_v13 = vmax.f32 %v333_v7, 0.0  ;;  %v423_v14 = vmax.f32 %v410_v8, 0.0 }
 0x1ac   :  { %v422_v11 = vmax.f32 %v335_v9, 0.0  ;;  %v424_v12 = vmax.f32 %v412_v10, 0.0 }
 0x1ae   :  { %v339_v15 = vpop.f32.mrb[4].mxu0  ;;  %v416_v16 = vpop.f32.mrb[4].mxu1  ;;  %493 = vmatprep.mubr.f32.mxu0 %v422_v11  ;;  %568 = vmatprep.mubr.f32.mxu1 %v424_v12 }
 0x1af   :  { %v341_v17 = vpop.f32.mrb[5].mxu0  ;;  %v418_v18 = vpop.f32.mrb[5].mxu1  ;;  %494 = vmatmul.mubr.f32.vlgmr.msra.gmra.mrb[6].mxu0 %v421_v13  ;;  %569 = vmatmul.mubr.f32.vlgmr.msra.gmra.mrb[6].mxu1 %v423_v14  ;;  %v425_v21 = vmax.f32 %v339_v15, 0.0  ;;  %v427_v22 = vmax.f32 %v416_v16, 0.0  ;;  %v1130_v14 = vmov 1966171168   ;;  %v836_v16 = vlaneseq }
 0x1b0   :  { %v426_v19 = vmax.f32 %v341_v17, 0.0  ;;  %v428_v20 = vmax.f32 %v418_v18, 0.0  ;;  %v834_v15 = vunpack.c.l.s4 %v1130_v14 }
 0x1b1   :  { %v837_v18 = vshrl.u32 %v836_v16, 7 }
 0x1b2   :  { %498 = vmatprep.mubr.f32.mxu0 %v426_v19  ;;  %573 = vmatprep.mubr.f32.mxu1 %v428_v20  ;;  %v835_v17 = vunpack.c.0.s8 %v834_v15 }
 0x1b3   :  { %499 = vmatmul.mubr.f32.gmra.mrb[8].mxu0 %v425_v21  ;;  %574 = vmatmul.mubr.f32.gmra.mrb[8].mxu1 %v427_v22 }
 0x1b4   :  { %987 = vmatprep.mubr.msk.f32.mxu1 %vm1128_vm1, %v1127_v3  ;;  %1003 = vmatprep.mubr.msk.f32.mxu0 %vm1128_vm1, %v1127_v3  ;;  %v838_v20 = vsub.s32 %v835_v17, %v837_v18 }
 0x282   :  { %v922_v23 = vpop.f32.mrb[6].mxu0  ;;  %v960_v24 = vpop.f32.mrb[6].mxu1 }
 0x283   :  { %v923_v25 = vpop.f32.mrb[7].mxu0  ;;  %v961_v26 = vpop.f32.mrb[7].mxu1 }
 0x284   :  { %v924_v27 = vadd.f32 %v923_v25, %v922_v23  ;;  %v962_v28 = vadd.f32 %v961_v26, %v960_v24 }
 0x286   :  { %v571_v29 = vadd.f32 %v962_v28, %v924_v27  ;;  %v925_v30 = vpop.f32.mrb[8].mxu0  ;;  %v963_v31 = vpop.f32.mrb[8].mxu1 }
 0x287   :  { %v926_v32 = vpop.f32.mrb[9].mxu0  ;;  %v964_v33 = vpop.f32.mrb[9].mxu1 }
 0x288   :  { %v927_v34 = vadd.f32 %v926_v32, %v925_v30  ;;  %v965_v35 = vadd.f32 %v964_v33, %v963_v31  ;;  %986 = vmatpush3.msra.mxu1 %v571_v29 }
 0x289   :  { %988 = vmatmul.mubr.msk.f32.vlgmr.msra.gmra.mrb[10].mxu1 %vm113_vm0, %v1175_v1  ;;  %990 = vmatprep.subr.mxu1 %v1127_v3  ;;  %v1129_v1 = vmov 0.0|0.0  }
 0x28a   :  { %v576_v36 = vadd.f32 %v965_v35, %v927_v34  ;;  %992 = vmatprep.mubr.msk.f32.mxu1 %vm1128_vm1, %v1127_v3  ;;  %1086 = vmatprep.subr.bf16.mxu0 %v1129_v1  ;;  %v106_v3 = vld [vmem:[%s1489_s4 + $0x10] sm:$0xff] }
 0x28b   :  { %1088 = vmatpush3.bf16.msra.mxu0 %v1087_v39 }
 0x28c   :  { %991 = vmatpush3.msra.mxu1 %v576_v36  ;;  %1089 = vmatprep.subr.bf16.mxu0 %v1129_v1 }
 0x28d   :  { %993 = vmatmul.mubr.msk.f32.vlgmr.msra.gmra.mrb[12].mxu1 %vm113_vm0, %v1186_v4  ;;  %v107_v4 = vld [vmem:[%s1489_s4 + $0x18] sm:$0xff] }
 0x28e   :  { %v1090_v40 = vpack.c.bf16 %v107_v4, %v106_v3 }
 0x290   :  { %1091 = vmatpush3.bf16.msra.mxu0 %v1090_v40 }
 0x35c   :  { %v645_v41 = vpop.f32.mrb[10].mxu1 }
 0x35d   :  { %v719_v42 = vmax.f32 %v645_v41, 0.0  ;;  %v989_v43 = vpop.f32.mrb[11].mxu1 }
 0x35f   :  { %v721_v44 = vsel %vm260_vm2, %v719_v42, 0.0 }
 0x360   :  { %v722_v45 = vrot.slane %v721_v44, 4  ;;  %v715_v46 = vpop.f32.mrb[12].mxu1 }
 0x361   :  { %v720_v47 = vmax.f32 %v715_v46, 0.0  ;;  %v994_v48 = vpop.f32.mrb[13].mxu1 }
 0x362   :  { %v723_v49 = vadd.f32 %v722_v45, %v721_v44 }
 0x363   :  { %v728_v50 = vsel %vm260_vm2, %v720_v47, 0.0 }
 0x364   :  { %v724_v51 = vrot.slane %v723_v49, 2  ;;  %v729_v52 = vrot.slane %v728_v50, 4 }
 0x366   :  { %v725_v53 = vadd.f32 %v724_v51, %v723_v49  ;;  %v730_v54 = vadd.f32 %v729_v52, %v728_v50 }
 0x368   :  { %v726_v55 = vrot.slane %v725_v53, 1  ;;  %v731_v56 = vrot.slane %v730_v54, 2 }
 0x36a   :  { %v732_v57 = vadd.f32 %v731_v56, %v730_v54  ;;  %v727_v58 = vadd.f32 %v726_v55, %v725_v53 }
 0x36c   :  { %v733_v59 = vrot.slane %v732_v57, 1  ;;  %v735_v61 = vmul.f32 0.125, %v727_v58 }
 0x36e   :  { %v734_v60 = vadd.f32 %v733_v59, %v732_v57 }
 0x370   :  { %v736_v62 = vmul.f32 0.125, %v734_v60 }
 0x372   :  { %v746_v63 = vsel %vm745_vm3, %v736_v62, %v735_v61 }
 0x373   :  { %1004 = vmatmul.mubr.msk.f32.vlgmr.msra.gmra.mrb[10].mxu0 %vm260_vm2, %v746_v63 }
 0x446   :  { %v815_v2 = vpop.f32.mrb[10].mxu0 }
 0x447   :  { %v816_v5 = vadd.f32 %v884_v0, %v815_v2  ;;  %v1005_v6 = vpop.f32.mrb[11].mxu0 }
 0x449   :  { %v820_v7 = vsel %vm819_vm4, %v816_v5, -inf }
 0x44a   :  { %821 = vmax.xlane.f32.xlu0 %v820_v7 }
 0x4d7   :  { %v822_v8 = vpop.xlane.xlu0 %821 }
 0x4d8   :  { %v823_v9 = vsub.f32 %v816_v5, %v822_v8 }
 0x4da   :  { %v824_v10 = vmul.f32 1.442695, %v823_v9 }
 0x4dc   :  { %1099 = vpow2.f32 %v824_v10 }
 0x4e6   :  { %v1100_v11 = vpop.eup %1099 }
 0x4e7   :  { %v826_v12 = vsel %vm819_vm4, %v1100_v11, 0.0 }
 0x4e8   :  { %827 = vadd.xlane.f32.xlu0 %v826_v12 }
 0x575   :  { %v828_v13 = vpop.xlane.xlu0 %827 }
 0x576   :  { %1101 = vlog2.f32 %v828_v13 }
 0x580   :  { %v1102_v19 = vpop.eup %1101 }
 0x581   :  { %v830_v21 = vmul.f32 0.6931472, %v1102_v19 }
 0x583   :  { %v831_v22 = vsub.f32 %v823_v9, %v830_v21 }
 0x585   :  { %v839_v23 = vrot.slane %v831_v22, %v838_v20 }
 0x587   :  { %v840_v24 = vcombine.high %v839_v23, %v839_v23  ;;  %v847_v25 = vrot.slane %v839_v23, %v838_v20 }
 0x589   :  { %v854_v26 = vrot.slane %v840_v24, %v838_v20  ;;  %858 = vst.msk [vmem:[#allocation2] sm:$0x1] %vm857_vm5, %v847_v25 }
 0x58b   :  { %859 = vst.msk [vmem:[#allocation2 + $0x1] sm:$0x1] %vm857_vm5, %v854_v26 }
 0x58c   :  { %1114 = shalt.err (!%p1111_p4)
}
 0x58d   :  { %s1115_s2 = scalar_lea.hbm %s1491_s6, 32 }
 0x58e   :  { %p1116_p5 = scmp.ne.s32.totalorder %s1491_s6, %s1115_s2  ;;  %p1119_p6 = scmp.lt.u32.totalorder %s1115_s2, %s1491_s6 }
 0x590   :  { %p1121_p7 = pnand %p1119_p6, %p1116_p5 }
 0x592   :  { %1124 = shalt.err (!%p1121_p7)
}
 0x593   :  { %s1132_s18 = smov 16   ;;  %s1133_s19 = smov 1  }
 0x594   :  { %871 = dma.vmem_to_hbm [thread:$0]  %s866_s11, 32, %s1491_s6, [#allocation3], %s1132_s18, %s1132_s18, %s1133_s19  }
 0x595   :  { %1125 = dma.done.wait [#allocation3], 32  }
 0x596   :  { %1126 = vsyncadd [#allocation3], 4294967264 }
 0x597   :  { %875 = vsyncpa [#allocation3], 1 }

</bundles_post_ra>
